<compile_context>
chip_gen: v7x
topology: tpu7x:2x2x1
jax: 0.10.0
libtpu: 0.0.40
codegen_flags: <defaults>
</compile_context>

<pallas_src>
import jax
import jax.numpy as jnp
from jax.experimental import pallas as pl
from jax.experimental.pallas import tpu as pltpu

TILE_N = 1024  # default batch tile on the lane axis (multiple of 128)


def _hybrid_kernel(x_ref, w1_ref, b1_ref, w2_ref, b2_ref, w3_ref, b3_ref,
                   w4_ref, b4_ref, out_ref):
    # Activations are (features, TILE_N): batch on lanes, features on sublanes.
    x = x_ref[...]

    def layer(w_ref, b_ref, h):
        # MXU matmul with f32 accumulation; bias (out, 1) broadcasts over lanes.
        return jnp.dot(w_ref[...], h.astype(w_ref.dtype),
                       preferred_element_type=jnp.float32) + b_ref[...]

    h = jnp.maximum(layer(w1_ref, b1_ref, x), 0.0)   # (64,  T) standardize folded in
    h = jnp.maximum(layer(w2_ref, b2_ref, h), 0.0)   # (128, T)
    h = jnp.maximum(layer(w3_ref, b3_ref, h), 0.0)   # (64,  T)
    o = layer(w4_ref, b4_ref, h)                     # (2,   T)

    # row 0 -> weight head: sigmoid (clamp dropped; sigmoid already in (0,1))
    # row 1 -> bias head:   relu
    row = jax.lax.broadcasted_iota(jnp.int32, o.shape, 0)
    out_ref[...] = jnp.where(row == 0, jax.nn.sigmoid(o), jnp.maximum(o, 0.0))


def hybrid_share_net(x, params, *, tile_n=TILE_N, mxu_dtype=jnp.float32):
    """x: (N, 3) float32. params in PyTorch layout (weights (out,in), biases (out,)).
    Returns (weight, bias), each (N,) float32."""
    mean, std, w1, b1, w2, b2, w3, b3, w4, b4 = params
    n = x.shape[0]

    # Fold StandardizeLayer ((x - mean)/std) into the first Linear (host-side, once).
    inv_std = (1.0 / std).astype(jnp.float32)
    w1f = (w1.astype(jnp.float32) * inv_std[None, :])
    b1f = (b1.astype(jnp.float32) - w1f @ mean.astype(jnp.float32))

    def prep_w(w):
        return w.astype(mxu_dtype)                    # matmul operand

    def prep_b(b):
        return b.reshape(-1, 1).astype(jnp.float32)   # (out, 1): broadcast over lanes

    wb = [prep_w(w1f), prep_b(b1f), prep_w(w2), prep_b(b2),
          prep_w(w3), prep_b(b3), prep_w(w4), prep_b(b4)]

    # Adaptive tile: never larger than the 128-rounded batch (avoids padding waste
    # for small N), never smaller than 128 (keeps stores lane-dense/unmasked).
    n_128 = ((n + 127) // 128) * 128
    tile_n = max(128, min(tile_n, n_128))
    n_pad = ((n + tile_n - 1) // tile_n) * tile_n

    # Batch on lanes: (N, 3) -> (3, N_pad), zero-padded to a multiple of tile_n.
    xt = jnp.zeros((3, n_pad), mxu_dtype).at[:, :n].set(x.T.astype(mxu_dtype))

    grid = (n_pad // tile_n,)

    def const_spec(arr):
        # Constant block index -> weights/biases DMA'd once, resident across steps.
        return pl.BlockSpec(arr.shape, lambda i: (0, 0))

    out = pl.pallas_call(
        _hybrid_kernel,
        out_shape=jax.ShapeDtypeStruct((2, n_pad), jnp.float32),
        grid_spec=pltpu.PrefetchScalarGridSpec(
            num_scalar_prefetch=0,
            grid=grid,
            in_specs=[pl.BlockSpec((3, tile_n), lambda i: (0, i))]
                     + [const_spec(a) for a in wb],
            out_specs=pl.BlockSpec((2, tile_n), lambda i: (0, i)),
        ),
        compiler_params=pltpu.CompilerParams(
            dimension_semantics=("parallel",)),   # batch axis shards across TCs on v7x
    )(xt, *wb)

    return out[0, :n], out[1, :n]


def init_params(key):
    """Deterministic params mimicking PyTorch nn.Linear defaults
    (uniform(-1/sqrt(fan_in), 1/sqrt(fan_in))), weights stored (out_features, in_features).
    Uses non-trivial mean/std to exercise the standardization fold."""
    dims = [(3, 64), (64, 128), (128, 64), (64, 2)]
    params = [
        jnp.array([0.5, -1.0, 2.0], jnp.float32),   # imean
        jnp.array([1.5, 0.7, 2.2], jnp.float32),    # istd
    ]
    keys = jax.random.split(key, 2 * len(dims))
    for idx, (fan_in, fan_out) in enumerate(dims):
        bound = 1.0 / (fan_in ** 0.5)
        w = jax.random.uniform(keys[2 * idx], (fan_out, fan_in),
                               jnp.float32, -bound, bound)
        b = jax.random.uniform(keys[2 * idx + 1], (fan_out,),
                               jnp.float32, -bound, bound)
        params.append(w)
        params.append(b)
    return tuple(params)


def reference_forward(x, params):
    """Pure-JAX reference matching the PyTorch forward semantics."""
    mean, std, w1, b1, w2, b2, w3, b3, w4, b4 = params
    h = (x - mean) / std
    h = jnp.maximum(h @ w1.T + b1, 0.0)
    h = jnp.maximum(h @ w2.T + b2, 0.0)
    h = jnp.maximum(h @ w3.T + b3, 0.0)
    o = h @ w4.T + b4
    weight = jnp.clip(jax.nn.sigmoid(o[:, 0]), 0.0, 1.0)
    bias = jnp.maximum(o[:, 1], 0.0)
    return weight, bias


if __name__ == "__main__":
    key = jax.random.PRNGKey(0)
    pkey, xkey = jax.random.split(key)
    params = init_params(pkey)

    N = 300  # non-multiple of 128 to exercise padding; adaptive tile -> 384, grid = 1
    x = jax.random.normal(xkey, (N, 3), jnp.float32)

    weight, bias = hybrid_share_net(x, params)
    jax.block_until_ready((weight, bias))

    w_ref, b_ref = reference_forward(x, params)
    assert weight.shape == (N,) and bias.shape == (N,)
    assert jnp.allclose(weight, w_ref, atol=2e-4, rtol=2e-4)
    assert jnp.allclose(bias, b_ref, atol=2e-4, rtol=2e-4)

    # Also exercise a multi-step grid (N larger than one default tile).
    N2 = 2500
    x2 = jax.random.normal(jax.random.PRNGKey(7), (N2, 3), jnp.float32)
    w2_out, b2_out = hybrid_share_net(x2, params)
    jax.block_until_ready((w2_out, b2_out))
    w2_ref, b2_ref = reference_forward(x2, params)
    assert jnp.allclose(w2_out, w2_ref, atol=2e-4, rtol=2e-4)
    assert jnp.allclose(b2_out, b2_ref, atol=2e-4, rtol=2e-4)

    print("KERNEL_OK")
</pallas_src>

<mosaic_0001>
module attributes {stable_mosaic.version = 11 : i64} {
  func.func @_hybrid_kernel(%arg0: i32, %arg1: memref<3x384xf32, #tpu.memory_space<vmem>>, %arg2: memref<64x3xf32, #tpu.memory_space<vmem>>, %arg3: memref<64x1xf32, #tpu.memory_space<vmem>>, %arg4: memref<128x64xf32, #tpu.memory_space<vmem>>, %arg5: memref<128x1xf32, #tpu.memory_space<vmem>>, %arg6: memref<64x128xf32, #tpu.memory_space<vmem>>, %arg7: memref<64x1xf32, #tpu.memory_space<vmem>>, %arg8: memref<2x64xf32, #tpu.memory_space<vmem>>, %arg9: memref<2x1xf32, #tpu.memory_space<vmem>>, %arg10: memref<2x384xf32, #tpu.memory_space<vmem>>) attributes {dimension_semantics = [#tpu.dimension_semantics<parallel>], iteration_bounds = array<i64: 1>, scalar_prefetch = 0 : i64, scratch_operands = 0 : i64, tpu.core_type = #tpu.core_type<tc>, window_params = [{transform_indices = @transform_0, window_bounds = array<i64: 3, 384>}, {pipeline_mode = #tpu.pipeline_mode<synchronous>, transform_indices = @transform_1, window_bounds = array<i64: 64, 3>}, {pipeline_mode = #tpu.pipeline_mode<synchronous>, transform_indices = @transform_2, window_bounds = array<i64: 64, 1>}, {pipeline_mode = #tpu.pipeline_mode<synchronous>, transform_indices = @transform_3, window_bounds = array<i64: 128, 64>}, {pipeline_mode = #tpu.pipeline_mode<synchronous>, transform_indices = @transform_4, window_bounds = array<i64: 128, 1>}, {pipeline_mode = #tpu.pipeline_mode<synchronous>, transform_indices = @transform_5, window_bounds = array<i64: 64, 128>}, {pipeline_mode = #tpu.pipeline_mode<synchronous>, transform_indices = @transform_6, window_bounds = array<i64: 64, 1>}, {pipeline_mode = #tpu.pipeline_mode<synchronous>, transform_indices = @transform_7, window_bounds = array<i64: 2, 64>}, {pipeline_mode = #tpu.pipeline_mode<synchronous>, transform_indices = @transform_8, window_bounds = array<i64: 2, 1>}, {transform_indices = @transform_9, window_bounds = array<i64: 2, 384>}]} {
    %c0 = arith.constant 0 : index
    %c0_0 = arith.constant 0 : index
    %0 = vector.load %arg1[%c0, %c0_0] : memref<3x384xf32, #tpu.memory_space<vmem>>, vector<3x384xf32>
    %c0_1 = arith.constant 0 : index
    %c0_2 = arith.constant 0 : index
    %1 = vector.load %arg2[%c0_1, %c0_2] : memref<64x3xf32, #tpu.memory_space<vmem>>, vector<64x3xf32>
    %cst = arith.constant dense<0.000000e+00> : vector<64x384xf32>
    %2 = tpu.matmul %1, %0, %cst {dimension_numbers = #tpu.dot_dimension_numbers<[1], [0], [0], [1], [0, 0, 1, 1], [], []>} : vector<64x3xf32>, vector<3x384xf32>, vector<64x384xf32> -> vector<64x384xf32>
    %c0_3 = arith.constant 0 : index
    %c0_4 = arith.constant 0 : index
    %3 = vector.load %arg3[%c0_3, %c0_4] : memref<64x1xf32, #tpu.memory_space<vmem>>, vector<64x1xf32>
    %4 = vector.broadcast %3 : vector<64x1xf32> to vector<64x384xf32>
    %5 = arith.addf %2, %4 : vector<64x384xf32>
    %cst_5 = arith.constant 0.000000e+00 : f32
    %6 = vector.broadcast %cst_5 : f32 to vector<64x384xf32>
    %7 = arith.maximumf %5, %6 : vector<64x384xf32>
    %c0_6 = arith.constant 0 : index
    %c0_7 = arith.constant 0 : index
    %8 = vector.load %arg4[%c0_6, %c0_7] : memref<128x64xf32, #tpu.memory_space<vmem>>, vector<128x64xf32>
    %cst_8 = arith.constant dense<0.000000e+00> : vector<128x384xf32>
    %9 = tpu.matmul %8, %7, %cst_8 {dimension_numbers = #tpu.dot_dimension_numbers<[1], [0], [0], [1], [0, 0, 1, 1], [], []>} : vector<128x64xf32>, vector<64x384xf32>, vector<128x384xf32> -> vector<128x384xf32>
    %c0_9 = arith.constant 0 : index
    %c0_10 = arith.constant 0 : index
    %10 = vector.load %arg5[%c0_9, %c0_10] : memref<128x1xf32, #tpu.memory_space<vmem>>, vector<128x1xf32>
    %11 = vector.broadcast %10 : vector<128x1xf32> to vector<128x384xf32>
    %12 = arith.addf %9, %11 : vector<128x384xf32>
    %cst_11 = arith.constant 0.000000e+00 : f32
    %13 = vector.broadcast %cst_11 : f32 to vector<128x384xf32>
    %14 = arith.maximumf %12, %13 : vector<128x384xf32>
    %c0_12 = arith.constant 0 : index
    %c0_13 = arith.constant 0 : index
    %15 = vector.load %arg6[%c0_12, %c0_13] : memref<64x128xf32, #tpu.memory_space<vmem>>, vector<64x128xf32>
    %cst_14 = arith.constant dense<0.000000e+00> : vector<64x384xf32>
    %16 = tpu.matmul %15, %14, %cst_14 {dimension_numbers = #tpu.dot_dimension_numbers<[1], [0], [0], [1], [0, 0, 1, 1], [], []>} : vector<64x128xf32>, vector<128x384xf32>, vector<64x384xf32> -> vector<64x384xf32>
    %c0_15 = arith.constant 0 : index
    %c0_16 = arith.constant 0 : index
    %17 = vector.load %arg7[%c0_15, %c0_16] : memref<64x1xf32, #tpu.memory_space<vmem>>, vector<64x1xf32>
    %18 = vector.broadcast %17 : vector<64x1xf32> to vector<64x384xf32>
    %19 = arith.addf %16, %18 : vector<64x384xf32>
    %cst_17 = arith.constant 0.000000e+00 : f32
    %20 = vector.broadcast %cst_17 : f32 to vector<64x384xf32>
    %21 = arith.maximumf %19, %20 : vector<64x384xf32>
    %c0_18 = arith.constant 0 : index
    %c0_19 = arith.constant 0 : index
    %22 = vector.load %arg8[%c0_18, %c0_19] : memref<2x64xf32, #tpu.memory_space<vmem>>, vector<2x64xf32>
    %cst_20 = arith.constant dense<0.000000e+00> : vector<2x384xf32>
    %23 = tpu.matmul %22, %21, %cst_20 {dimension_numbers = #tpu.dot_dimension_numbers<[1], [0], [0], [1], [0, 0, 1, 1], [], []>} : vector<2x64xf32>, vector<64x384xf32>, vector<2x384xf32> -> vector<2x384xf32>
    %c0_21 = arith.constant 0 : index
    %c0_22 = arith.constant 0 : index
    %24 = vector.load %arg9[%c0_21, %c0_22] : memref<2x1xf32, #tpu.memory_space<vmem>>, vector<2x1xf32>
    %25 = vector.broadcast %24 : vector<2x1xf32> to vector<2x384xf32>
    %26 = arith.addf %23, %25 : vector<2x384xf32>
    %27 = tpu.iota {dimensions = array<i32: 0>} : vector<2x384xi32>
    %c0_i32 = arith.constant 0 : i32
    %28 = vector.broadcast %c0_i32 : i32 to vector<2x384xi32>
    %29 = arith.cmpi eq, %27, %28 : vector<2x384xi32>
    %30 = arith.negf %26 : vector<2x384xf32>
    %31 = math.exp %30 : vector<2x384xf32>
    %cst_23 = arith.constant 1.000000e+00 : f32
    %32 = vector.broadcast %cst_23 : f32 to vector<2x384xf32>
    %33 = arith.addf %32, %31 : vector<2x384xf32>
    %34 = arith.divf %32, %33 : vector<2x384xf32>
    %cst_24 = arith.constant 0.000000e+00 : f32
    %35 = vector.broadcast %cst_24 : f32 to vector<2x384xf32>
    %36 = arith.maximumf %26, %35 : vector<2x384xf32>
    %37 = arith.select %29, %34, %36 : vector<2x384xi1>, vector<2x384xf32>
    %c0_25 = arith.constant 0 : index
    %c0_26 = arith.constant 0 : index
    %38 = vector.load %arg10[%c0_25, %c0_26] : memref<2x384xf32, #tpu.memory_space<vmem>>, vector<2x384xf32>
    tpu.vector_store %arg10[%c0_25, %c0_26], %37 {strides = array<i32>} : memref<2x384xf32, #tpu.memory_space<vmem>>, vector<2x384xf32>,
    return
  }
  func.func @transform_0(%arg0: i32) -> (i32, i32) {
    %c0_i32 = arith.constant 0 : i32
    %c0_i32_0 = arith.constant 0 : i32
    return %c0_i32, %arg0 : i32, i32
  }
  func.func @transform_1(%arg0: i32) -> (i32, i32) {
    %c0_i32 = arith.constant 0 : i32
    %c0_i32_0 = arith.constant 0 : i32
    %c0_i32_1 = arith.constant 0 : i32
    return %c0_i32, %c0_i32_0 : i32, i32
  }
  func.func @transform_2(%arg0: i32) -> (i32, i32) {
    %c0_i32 = arith.constant 0 : i32
    %c0_i32_0 = arith.constant 0 : i32
    %c0_i32_1 = arith.constant 0 : i32
    return %c0_i32, %c0_i32_0 : i32, i32
  }
  func.func @transform_3(%arg0: i32) -> (i32, i32) {
    %c0_i32 = arith.constant 0 : i32
    %c0_i32_0 = arith.constant 0 : i32
    %c0_i32_1 = arith.constant 0 : i32
    return %c0_i32, %c0_i32_0 : i32, i32
  }
  func.func @transform_4(%arg0: i32) -> (i32, i32) {
    %c0_i32 = arith.constant 0 : i32
    %c0_i32_0 = arith.constant 0 : i32
    %c0_i32_1 = arith.constant 0 : i32
    return %c0_i32, %c0_i32_0 : i32, i32
  }
  func.func @transform_5(%arg0: i32) -> (i32, i32) {
    %c0_i32 = arith.constant 0 : i32
    %c0_i32_0 = arith.constant 0 : i32
    %c0_i32_1 = arith.constant 0 : i32
    return %c0_i32, %c0_i32_0 : i32, i32
  }
  func.func @transform_6(%arg0: i32) -> (i32, i32) {
    %c0_i32 = arith.constant 0 : i32
    %c0_i32_0 = arith.constant 0 : i32
    %c0_i32_1 = arith.constant 0 : i32
    return %c0_i32, %c0_i32_0 : i32, i32
  }
  func.func @transform_7(%arg0: i32) -> (i32, i32) {
    %c0_i32 = arith.constant 0 : i32
    %c0_i32_0 = arith.constant 0 : i32
    %c0_i32_1 = arith.constant 0 : i32
    return %c0_i32, %c0_i32_0 : i32, i32
  }
  func.func @transform_8(%arg0: i32) -> (i32, i32) {
    %c0_i32 = arith.constant 0 : i32
    %c0_i32_0 = arith.constant 0 : i32
    %c0_i32_1 = arith.constant 0 : i32
    return %c0_i32, %c0_i32_0 : i32, i32
  }
  func.func @transform_9(%arg0: i32) -> (i32, i32) {
    %c0_i32 = arith.constant 0 : i32
    %c0_i32_0 = arith.constant 0 : i32
    return %c0_i32, %arg0 : i32, i32
  }
}

</mosaic_0001>

<bundles_post_ra>
// kernel: tpu_custom_call.1
= control target key start
LH: loop header
LB: loop body
LE: loop exit
PB: predicated region body
PF: predicated region fallthrough
CT: control target
= control target key end

     0   :  { %vm119_vm0 = vcmask 1042432   ;;  %vm94_vm1 = vcmask 23552   ;;  %v1802_v6 = vmov 0.0   ;;  %v1803_v7 = vmov 0   ;;  %s2316_s0 = inlined_call_operand.vmem [shape: f32[3,384], index: 0, kind: input, shape index: {}]   ;;  %s2317_s1 = inlined_call_operand.vmem [shape: f32[64,3], index: 1, kind: input, shape index: {}]   ;;  %s2318_s2 = inlined_call_operand.vmem [shape: f32[64,1], index: 2, kind: input, shape index: {}]   ;;  %s2319_s3 = inlined_call_operand.vmem [shape: f32[128,64], index: 3, kind: input, shape index: {}]   ;;  %s2320_s4 = inlined_call_operand.vmem [shape: f32[128,1], index: 4, kind: input, shape index: {}]   ;;  %s2321_s5 = inlined_call_operand.vmem [shape: f32[64,128], index: 5, kind: input, shape index: {}]   ;;  %s2322_s6 = inlined_call_operand.vmem [shape: f32[64,1], index: 6, kind: input, shape index: {}]   ;;  %s2323_s7 = inlined_call_operand.vmem [shape: f32[2,64], index: 7, kind: input, shape index: {}]   ;;  %s2324_s8 = inlined_call_operand.vmem [shape: f32[2,1], index: 8, kind: input, shape index: {}]   ;;  %s2325_s9 = inlined_call_operand.hbm [shape: f32[2,384], index: 9, kind: output, shape index: {}]  }
   0x1   :  { %v34_v0 = vld [vmem:[%s2316_s0 + $0x8] sm:$0x7]  ;;  %v35_v1 = vld [vmem:[%s2317_s1] sm:$0xff]  ;;  %v37_v4 = vld [vmem:[%s2317_s1 + $0x10] sm:$0xff]  ;;  %190 = vmatprep.mubr.f32.mxu0 %v1802_v6  ;;  %1763 = vset.pattern.permute.xlu0 %v1803_v7 }
   0x2   :  { %v36_v2 = vld [vmem:[%s2317_s1 + $0x8] sm:$0xff]  ;;  %1516 = vmatprep.subr.msk.mxu1 %vm119_vm0, %v34_v0  ;;  %1518 = vmatprep.mubr.msk.f32.mxu1 %vm94_vm1, %v35_v1  ;;  %v33_v3 = vld [vmem:[%s2316_s0] sm:$0x77]  ;;  %v38_v9 = vld [vmem:[%s2317_s1 + $0x18] sm:$0xff] }
   0x3   :  { %1517 = vmatpush3.msk.msra.mxu1 %vm119_vm0, %v34_v0  ;;  %v93_v5 = vcombine.high %v33_v3, %v33_v3  ;;  %v43_v8 = vld [vmem:[%s2318_s2] sm:$0xff]  ;;  %v45_v11 = vld [vmem:[%s2318_s2 + $0x10] sm:$0xff]  ;;  %v44_v12 = vld [vmem:[%s2318_s2 + $0x8] sm:$0xff]  ;;  %1764 = vset.pattern.permute.xlu1 %v1803_v7 }
   0x4   :  { %1519 = vmatmul.mubr.msk.f32.vlgmr.msra.gmra.mrb[0].mxu1 %vm94_vm1, %v36_v2  ;;  %v39_v10 = vld [vmem:[%s2317_s1 + $0x20] sm:$0xff]  ;;  %53 = vperm.xlu0 %1763, %v43_v8   ;;  %v40_v13 = vld [vmem:[%s2317_s1 + $0x28] sm:$0xff]  ;;  %v41_v14 = vld [vmem:[%s2317_s1 + $0x30] sm:$0xff] }
   0x5   :  { %1394 = vmatprep.subr.msk.mxu0 %vm119_vm0, %v93_v5  ;;  %1521 = vmatprep.mubr.msk.f32.mxu1 %vm94_vm1, %v37_v4  ;;  %v46_v15 = vld [vmem:[%s2318_s2 + $0x18] sm:$0xff]  ;;  %v47_v16 = vld [vmem:[%s2318_s2 + $0x20] sm:$0xff]  ;;  %v48_v18 = vld [vmem:[%s2318_s2 + $0x28] sm:$0xff] }
   0x6   :  { %1395 = vmatpush1.msk.msra.mxu0 %vm119_vm0, %v33_v3  ;;  %63 = vperm.xlu1 %1764, %v45_v11   ;;  %v42_v17 = vld [vmem:[%s2317_s1 + $0x38] sm:$0xff]  ;;  %v49_v19 = vld [vmem:[%s2318_s2 + $0x30] sm:$0xff] }
   0x7   :  { %1396 = vmatmul.mubr.msk.f32.vlgmr.msra.gmra.mrb[0].mxu0 %vm94_vm1, %v35_v1 }
   0x8   :  { %1522 = vmatmul.mubr.msk.f32.gmra.mrb[2].mxu1 %vm94_vm1, %v38_v9  ;;  %196 = vmatprep.mubr.f32.mxu0 %v1802_v6 }
   0x9   :  { %1524 = vmatprep.mubr.msk.f32.mxu1 %vm94_vm1, %v39_v10  ;;  %58 = vperm.xlu0 %1763, %v44_v12  }
   0xa   :  { %68 = vperm.xlu1 %1764, %v46_v15  }
   0xb   :  { %1397 = vmatmul.mubr.msk.f32.gmra.mrb[2].mxu0 %vm94_vm1, %v36_v2 }
   0xc   :  { %1525 = vmatmul.mubr.msk.f32.gmra.mrb[4].mxu1 %vm94_vm1, %v40_v13  ;;  %202 = vmatprep.mubr.f32.mxu0 %v1802_v6 }
   0xd   :  { %1527 = vmatprep.mubr.msk.f32.mxu1 %vm94_vm1, %v41_v14  ;;  %73 = vperm.xlu0 %1763, %v47_v16  }
   0xf   :  { %1398 = vmatmul.mubr.msk.f32.gmra.mrb[4].mxu0 %vm94_vm1, %v37_v4 }
  0x10   :  { %14 = vsyncpa [#allocation3], 0  ;;  %1528 = vmatmul.mubr.msk.f32.gmra.mrb[6].mxu1 %vm94_vm1, %v42_v17  ;;  %208 = vmatprep.mubr.f32.mxu0 %v1802_v6  ;;  %v50_v20 = vld [vmem:[%s2318_s2 + $0x38] sm:$0xff]  ;;  %v384_v21 = vld [vmem:[%s2320_s4] sm:$0xff]  ;;  %vm480_vm2 = vcmask 523264   ;;  %vm1805_vm3 = vmmov 0  }
  0x11   :  { %78 = vperm.xlu1 %1764, %v48_v18   ;;  %593 = vmatprep.mubr.f32.mxu1 %v1802_v6  ;;  %v385_v22 = vld [vmem:[%s2320_s4 + $0x8] sm:$0xff]  ;;  %v386_v23 = vld [vmem:[%s2320_s4 + $0x10] sm:$0xff]  ;;  %v387_v24 = vld [vmem:[%s2320_s4 + $0x18] sm:$0xff] }
  0x12   :  { %83 = vperm.xlu0 %1763, %v49_v19   ;;  %v388_v25 = vld [vmem:[%s2320_s4 + $0x20] sm:$0xff]  ;;  %v389_v26 = vld [vmem:[%s2320_s4 + $0x28] sm:$0xff]  ;;  %v390_v27 = vld [vmem:[%s2320_s4 + $0x30] sm:$0xff] }
  0x13   :  { %1399 = vmatmul.mubr.msk.f32.gmra.mrb[6].mxu0 %vm94_vm1, %v38_v9  ;;  %v391_v28 = vld [vmem:[%s2320_s4 + $0x38] sm:$0xff]  ;;  %v392_v29 = vld [vmem:[%s2320_s4 + $0x40] sm:$0xff]  ;;  %v393_v30 = vld [vmem:[%s2320_s4 + $0x48] sm:$0xff] }
  0x14   :  { %214 = vmatprep.mubr.f32.mxu0 %v1802_v6  ;;  %v394_v31 = vld [vmem:[%s2320_s4 + $0x50] sm:$0xff]  ;;  %v395_v32 = vld [vmem:[%s2320_s4 + $0x58] sm:$0xff]  ;;  %v396_v33 = vld [vmem:[%s2320_s4 + $0x60] sm:$0xff] }
  0x15   :  { %88 = vperm.xlu1 %1764, %v50_v20   ;;  %v397_v34 = vld [vmem:[%s2320_s4 + $0x68] sm:$0xff]  ;;  %v398_v35 = vld [vmem:[%s2320_s4 + $0x70] sm:$0xff]  ;;  %v399_v36 = vld [vmem:[%s2320_s4 + $0x78] sm:$0xff] }
  0x16   :  { %402 = vperm.xlu0 %1763, %v384_v21   ;;  %v891_v37 = vld [vmem:[%s2322_s6] sm:$0xff]  ;;  %v892_v38 = vld [vmem:[%s2322_s6 + $0x8] sm:$0xff]  ;;  %v893_v39 = vld [vmem:[%s2322_s6 + $0x10] sm:$0xff] }
  0x17   :  { %1400 = vmatmul.mubr.msk.f32.gmra.mrb[8].mxu0 %vm94_vm1, %v39_v10  ;;  %v894_v40 = vld [vmem:[%s2322_s6 + $0x18] sm:$0xff]  ;;  %v895_v41 = vld [vmem:[%s2322_s6 + $0x20] sm:$0xff]  ;;  %v896_v42 = vld [vmem:[%s2322_s6 + $0x28] sm:$0xff] }
  0x18   :  { %220 = vmatprep.mubr.f32.mxu0 %v1802_v6  ;;  %v897_v43 = vld [vmem:[%s2322_s6 + $0x30] sm:$0xff]  ;;  %v898_v44 = vld [vmem:[%s2322_s6 + $0x38] sm:$0xff]  ;;  %v1182_v45 = vld [vmem:[%s2324_s8] sm:$0x3] }
  0x19   :  { %407 = vperm.xlu1 %1764, %v385_v22   ;;  %v2019_v46 = vld [vmem:[%s2319_s3] sm:$0xff] }
  0x1a   :  { %412 = vperm.xlu0 %1763, %v386_v23  }
  0x1b   :  { %1401 = vmatmul.mubr.msk.f32.gmra.mrb[10].mxu0 %vm94_vm1, %v40_v13 }
  0x1c   :  { %226 = vmatprep.mubr.f32.mxu0 %v1802_v6 }
  0x1d   :  { %417 = vperm.xlu1 %1764, %v387_v24  }
  0x1e   :  { %422 = vperm.xlu0 %1763, %v388_v25  }
  0x1f   :  { %1402 = vmatmul.mubr.msk.f32.gmra.mrb[12].mxu0 %vm94_vm1, %v41_v14 }
  0x20   :  { %232 = vmatprep.mubr.f32.mxu0 %v1802_v6 }
  0x21   :  { %427 = vperm.xlu1 %1764, %v389_v26  }
  0x22   :  { %432 = vperm.xlu0 %1763, %v390_v27  }
  0x23   :  { %1403 = vmatmul.mubr.msk.f32.gmra.mrb[14].mxu0 %vm94_vm1, %v42_v17 }
  0x24   :  { %1546 = vmatprep.mubr.msk.f32.mxu0 %vm480_vm2, %v2019_v46 }
  0x25   :  { %437 = vperm.xlu1 %1764, %v391_v28  }
  0x26   :  { %442 = vperm.xlu0 %1763, %v392_v29  }
  0x29   :  { %447 = vperm.xlu1 %1764, %v393_v30  }
  0x2a   :  { %452 = vperm.xlu0 %1763, %v394_v31  }
  0x2d   :  { %457 = vperm.xlu1 %1764, %v395_v32  }
  0x2e   :  { %462 = vperm.xlu0 %1763, %v396_v33  }
  0x31   :  { %467 = vperm.xlu1 %1764, %v397_v34  }
  0x32   :  { %472 = vperm.xlu0 %1763, %v398_v35  }
  0x35   :  { %477 = vperm.xlu1 %1764, %v399_v36  }
  0x36   :  { %901 = vperm.xlu0 %1763, %v891_v37  }
  0x39   :  { %906 = vperm.xlu1 %1764, %v892_v38  }
  0x3a   :  { %911 = vperm.xlu0 %1763, %v893_v39  }
  0x3d   :  { %916 = vperm.xlu1 %1764, %v894_v40  }
  0x3e   :  { %921 = vperm.xlu0 %1763, %v895_v41  }
  0x41   :  { %926 = vperm.xlu1 %1764, %v896_v42  }
  0x42   :  { %931 = vperm.xlu0 %1763, %v897_v43  }
  0x45   :  { %936 = vperm.xlu1 %1764, %v898_v44  }
  0x46   :  { %1185 = vperm.xlu0 %1763, %v1182_v45  }
  0x83   :  { %v54_v48 = vpop.permute.xlu0 %53 }
  0x85   :  { %v64_v47 = vpop.permute.xlu1 %63 }
  0x88   :  { %v59_v50 = vpop.permute.xlu0 %58 }
  0x89   :  { %v69_v49 = vpop.permute.xlu1 %68 }
  0x8c   :  { %v74_v2 = vpop.permute.xlu0 %73 }
  0x90   :  { %v2023_v60 = vpop.permute.xlu1 %78 }
  0x91   :  { %v84_v27 = vpop.permute.xlu0 %83 }
  0x94   :  { %v2026_v18 = vpop.permute.xlu1 %88 }
  0xd7   :  { %v1520_v51 = vpop.f32.mrb[0].mxu1 }
  0xd8   :  { %v311_v52 = vadd.f32 %v1520_v51, %v59_v50  ;;  %v305_v53 = vpop.f32.mrb[1].mxu1 }
  0xd9   :  { %v306_v54 = vadd.f32 %v305_v53, %v54_v48 }
  0xda   :  { %v349_v55 = vmax.f32 %v311_v52, 0.0  ;;  %v192_v56 = vpop.f32.mrb[0].mxu0  ;;  %v369_v52 = vld [vmem:[%s2319_s3 + $0x8] sm:$0xff] }
  0xdb   :  { %v346_v57 = vmax.f32 %v306_v54, 0.0  ;;  %v194_v58 = vpop.f32.mrb[1].mxu0  ;;  %v1523_v59 = vpop.f32.mrb[2].mxu1  ;;  %v193_v0 = vadd.f32 %v192_v56, %v54_v48 }
  0xdc   :  { %v321_v61 = vadd.f32 %v1523_v59, %v69_v49  ;;  %v315_v62 = vpop.f32.mrb[3].mxu1  ;;  %v195_v3 = vadd.f32 %v194_v58, %v54_v48  ;;  %v371_v59 = vld [vmem:[%s2319_s3 + $0x18] sm:$0xff] }
  0xdd   :  { %v1649_v63 = vpack.c.bf16 %v349_v55, %v346_v57  ;;  %v316_v1 = vadd.f32 %v315_v62, %v64_v47  ;;  %v344_v14 = vmax.f32 %v193_v0, 0.0 }
  0xde   :  { %v355_v4 = vmax.f32 %v321_v61, 0.0  ;;  %v198_v5 = vpop.f32.mrb[2].mxu0  ;;  %v345_v19 = vmax.f32 %v195_v3, 0.0 }
  0xdf   :  { %v352_v7 = vmax.f32 %v316_v1, 0.0  ;;  %v199_v8 = vadd.f32 %v198_v5, %v59_v50  ;;  %v200_v9 = vpop.f32.mrb[3].mxu0  ;;  %v1526_v10 = vpop.f32.mrb[4].mxu1  ;;  %1650 = vmatprep.subr.bf16.mxu0 %v1649_v63  ;;  %v373_v5 = vld [vmem:[%s2319_s3 + $0x28] sm:$0xff] }
  0xe0   :  { %v201_v11 = vadd.f32 %v200_v9, %v59_v50  ;;  %v331_v12 = vadd.f32 %v1526_v10, %v2023_v60  ;;  %v325_v13 = vpop.f32.mrb[5].mxu1  ;;  %1652 = vmatpush3.bf16.msra.mxu0 %v1649_v63  ;;  %v372_v63 = vld [vmem:[%s2319_s3 + $0x20] sm:$0xff] }
  0xe1   :  { %v1653_v15 = vpack.c.bf16 %v355_v4, %v352_v7  ;;  %v347_v16 = vmax.f32 %v199_v8, 0.0  ;;  %v326_v17 = vadd.f32 %v325_v13, %v74_v2  ;;  %v374_v8 = vld [vmem:[%s2319_s3 + $0x30] sm:$0xff] }
  0xe2   :  { %v348_v20 = vmax.f32 %v201_v11, 0.0  ;;  %v361_v21 = vmax.f32 %v331_v12, 0.0  ;;  %v204_v22 = vpop.f32.mrb[4].mxu0 }
  0xe3   :  { %v1635_v23 = vpack.c.bf16 %v347_v16, %v344_v14  ;;  %v358_v24 = vmax.f32 %v326_v17, 0.0  ;;  %v206_v25 = vpop.f32.mrb[5].mxu0  ;;  %v1529_v26 = vpop.f32.mrb[6].mxu1  ;;  %1654 = vmatprep.subr.bf16.mxu0 %v1653_v15  ;;  %v205_v32 = vadd.f32 %v204_v22, %v64_v47  ;;  %v375_v14 = vld [vmem:[%s2319_s3 + $0x38] sm:$0xff]  ;;  %v376_v17 = vld [vmem:[%s2319_s3 + $0x40] sm:$0xff] }
  0xe4   :  { %v1633_v28 = vpack.c.bf16 %v348_v20, %v345_v19  ;;  %v341_v29 = vadd.f32 %v1529_v26, %v2026_v18  ;;  %v335_v30 = vpop.f32.mrb[7].mxu1  ;;  %1656 = vmatpush3.bf16.msra.mxu0 %v1653_v15  ;;  %v207_v34 = vadd.f32 %v206_v25, %v64_v47  ;;  %v380_v25 = vld [vmem:[%s2319_s3 + $0x60] sm:$0xff]  ;;  %v381_v26 = vld [vmem:[%s2319_s3 + $0x68] sm:$0xff] }
  0xe5   :  { %v1657_v31 = vpack.c.bf16 %v361_v21, %v358_v24  ;;  %v336_v33 = vadd.f32 %v335_v30, %v84_v27  ;;  %v350_v41 = vmax.f32 %v205_v32, 0.0  ;;  %v379_v24 = vld [vmem:[%s2319_s3 + $0x58] sm:$0xff]  ;;  %v2138_v30 = vpop.permute.xlu0 %402 }
  0xe6   :  { %v367_v35 = vmax.f32 %v341_v29, 0.0  ;;  %v210_v36 = vpop.f32.mrb[6].mxu0  ;;  %1634 = vmatprep.subr.bf16.mxu1 %v1633_v28  ;;  %v351_v44 = vmax.f32 %v207_v34, 0.0  ;;  %v2133_v28 = vld [vmem:[%s2321_s5] sm:$0xff]  ;;  %v2136_v29 = vpop.permute.xlu1 %407 }
  0xe7   :  { %v364_v37 = vmax.f32 %v336_v33, 0.0  ;;  %v211_v38 = vadd.f32 %v210_v36, %v69_v49  ;;  %v212_v39 = vpop.f32.mrb[7].mxu0  ;;  %1636 = vmatpush1.bf16.msra.mxu1 %v1635_v23  ;;  %1658 = vmatprep.subr.bf16.mxu0 %v1657_v31  ;;  %v378_v23 = vld [vmem:[%s2319_s3 + $0x50] sm:$0xff] }
  0xe8   :  { %v213_v40 = vadd.f32 %v212_v39, %v69_v49  ;;  %1660 = vmatpush3.bf16.msra.mxu0 %v1657_v31  ;;  %v2035_v49 = vld [vmem:[%s2319_s3 + $0x10] sm:$0xff] }
  0xe9   :  { %v1661_v42 = vpack.c.bf16 %v367_v35, %v364_v37  ;;  %v353_v43 = vmax.f32 %v211_v38, 0.0  ;;  %v2142_v32 = vpop.permute.xlu0 %412 }
  0xea   :  { %v354_v45 = vmax.f32 %v213_v40, 0.0  ;;  %v216_v48 = vpop.f32.mrb[8].mxu0  ;;  %v2140_v31 = vpop.permute.xlu1 %417 }
  0xeb   :  { %v1639_v50 = vpack.c.bf16 %v353_v43, %v350_v41  ;;  %v218_v51 = vpop.f32.mrb[9].mxu0  ;;  %1662 = vmatprep.subr.bf16.mxu0 %v1661_v42  ;;  %v217_v53 = vadd.f32 %v216_v48, %v74_v2 }
  0xec   :  { %v1637_v47 = vpack.c.bf16 %v354_v45, %v351_v44  ;;  %1664 = vmatpush3.bf16.msra.mxu0 %v1661_v42  ;;  %v219_v54 = vadd.f32 %v218_v51, %v74_v2 }
  0xed   :  { %v356_v61 = vmax.f32 %v217_v53, 0.0  ;;  %v2146_v34 = vpop.permute.xlu0 %422 }
  0xee   :  { %v222_v55 = vpop.f32.mrb[10].mxu0  ;;  %1638 = vmatprep.subr.bf16.mxu1 %v1637_v47  ;;  %v357_v0 = vmax.f32 %v219_v54, 0.0  ;;  %v2144_v33 = vpop.permute.xlu1 %427 }
  0xef   :  { %v223_v56 = vadd.f32 %v222_v55, %v2023_v60  ;;  %v224_v57 = vpop.f32.mrb[11].mxu0  ;;  %1640 = vmatpush1.bf16.msra.mxu1 %v1639_v50  ;;  %1547 = vmatmul.mubr.msk.f32.vlgmr.msra.gmra.mrb[16].mxu0 %vm480_vm2, %v369_v52 }
  0xf0   :  { %v225_v58 = vadd.f32 %v224_v57, %v2023_v60  ;;  %1549 = vmatprep.mubr.msk.f32.mxu0 %vm480_vm2, %v2035_v49 }
  0xf1   :  { %v359_v62 = vmax.f32 %v223_v56, 0.0  ;;  %v2152_v43 = vpop.permute.xlu0 %432 }
  0xf2   :  { %v360_v1 = vmax.f32 %v225_v58, 0.0  ;;  %v228_v2 = vpop.f32.mrb[12].mxu0  ;;  %v2150_v39 = vpop.permute.xlu1 %437 }
  0xf3   :  { %v1643_v3 = vpack.c.bf16 %v359_v62, %v356_v61  ;;  %v230_v4 = vpop.f32.mrb[13].mxu0  ;;  %1550 = vmatmul.mubr.msk.f32.gmra.mrb[18].mxu0 %vm480_vm2, %v371_v59  ;;  %v229_v7 = vadd.f32 %v228_v2, %v84_v27 }
  0xf4   :  { %v1641_v60 = vpack.c.bf16 %v360_v1, %v357_v0  ;;  %1552 = vmatprep.mubr.msk.f32.mxu0 %vm480_vm2, %v372_v63  ;;  %v231_v9 = vadd.f32 %v230_v4, %v84_v27  ;;  %v382_v27 = vld [vmem:[%s2319_s3 + $0x70] sm:$0xff] }
  0xf5   :  { %v362_v15 = vmax.f32 %v229_v7, 0.0  ;;  %v2160_v57 = vpop.permute.xlu0 %442 }
  0xf6   :  { %v234_v10 = vpop.f32.mrb[14].mxu0  ;;  %1642 = vmatprep.subr.bf16.mxu1 %v1641_v60  ;;  %v363_v19 = vmax.f32 %v231_v9, 0.0  ;;  %v2156_v53 = vpop.permute.xlu1 %447 }
  0xf7   :  { %v235_v11 = vadd.f32 %v234_v10, %v2026_v18  ;;  %v236_v12 = vpop.f32.mrb[15].mxu0  ;;  %1644 = vmatpush1.bf16.msra.mxu1 %v1643_v3  ;;  %1553 = vmatmul.mubr.msk.f32.gmra.mrb[20].mxu0 %vm480_vm2, %v373_v5 }
  0xf8   :  { %v237_v13 = vadd.f32 %v236_v12, %v2026_v18  ;;  %1555 = vmatprep.mubr.msk.f32.mxu0 %vm480_vm2, %v374_v8  ;;  %v377_v18 = vld [vmem:[%s2319_s3 + $0x48] sm:$0xff] }
  0xf9   :  { %v365_v16 = vmax.f32 %v235_v11, 0.0 }
  0xfa   :  { %v366_v20 = vmax.f32 %v237_v13, 0.0  ;;  %v2164_v2 = vpop.permute.xlu1 %457 }
  0xfb   :  { %v1647_v21 = vpack.c.bf16 %v365_v16, %v362_v15  ;;  %1556 = vmatmul.mubr.msk.f32.gmra.mrb[22].mxu0 %vm480_vm2, %v375_v14 }
  0xfc   :  { %v1645_v22 = vpack.c.bf16 %v366_v20, %v363_v19  ;;  %1558 = vmatprep.mubr.msk.f32.mxu0 %vm480_vm2, %v376_v17 }
  0xfe   :  { %1646 = vmatprep.subr.bf16.mxu1 %v1645_v22  ;;  %v2170_v16 = vpop.permute.xlu1 %467 }
  0xff   :  { %1648 = vmatpush1.bf16.msra.mxu1 %v1647_v21  ;;  %1559 = vmatmul.mubr.msk.f32.gmra.mrb[24].mxu0 %vm480_vm2, %v377_v18 }
 0x100   :  { %1561 = vmatprep.mubr.msk.f32.mxu0 %vm480_vm2, %v378_v23 }
 0x102   :  { %1413 = vmatmul.mubr.msk.f32.vlgmr.msra.gmra.mrb[8].mxu1 %vm480_vm2, %v2019_v46  ;;  %v383_v46 = vld [vmem:[%s2319_s3 + $0x78] sm:$0xff] }
 0x103   :  { %1562 = vmatmul.mubr.msk.f32.gmra.mrb[26].mxu0 %vm480_vm2, %v379_v24  ;;  %599 = vmatprep.mubr.f32.mxu1 %v1802_v6 }
 0x104   :  { %1564 = vmatprep.mubr.msk.f32.mxu0 %vm480_vm2, %v380_v25 }
 0x106   :  { %1414 = vmatmul.mubr.msk.f32.gmra.mrb[10].mxu1 %vm480_vm2, %v369_v52 }
 0x107   :  { %1565 = vmatmul.mubr.msk.f32.gmra.mrb[28].mxu0 %vm480_vm2, %v381_v26  ;;  %605 = vmatprep.mubr.f32.mxu1 %v1802_v6 }
 0x108   :  { %1567 = vmatprep.mubr.msk.f32.mxu0 %vm480_vm2, %v382_v27 }
 0x10a   :  { %1415 = vmatmul.mubr.msk.f32.gmra.mrb[12].mxu1 %vm480_vm2, %v2035_v49 }
 0x10b   :  { %1568 = vmatmul.mubr.msk.f32.gmra.mrb[30].mxu0 %vm480_vm2, %v383_v46  ;;  %611 = vmatprep.mubr.f32.mxu1 %v1802_v6 }
 0x10c   :  { %1003 = vmatprep.mubr.f32.mxu0 %v1802_v6 }
 0x10e   :  { %1416 = vmatmul.mubr.msk.f32.gmra.mrb[14].mxu1 %vm480_vm2, %v371_v59 }
 0x10f   :  { %617 = vmatprep.mubr.f32.mxu1 %v1802_v6 }
 0x112   :  { %1417 = vmatmul.mubr.msk.f32.gmra.mrb[16].mxu1 %vm480_vm2, %v372_v63 }
 0x113   :  { %623 = vmatprep.mubr.f32.mxu1 %v1802_v6 }
 0x116   :  { %1418 = vmatmul.mubr.msk.f32.gmra.mrb[18].mxu1 %vm480_vm2, %v373_v5  ;;  %v2166_v5 = vpop.permute.xlu0 %452 }
 0x117   :  { %629 = vmatprep.mubr.f32.mxu1 %v1802_v6 }
 0x11a   :  { %1419 = vmatmul.mubr.msk.f32.gmra.mrb[20].mxu1 %vm480_vm2, %v374_v8 }
 0x11b   :  { %635 = vmatprep.mubr.f32.mxu1 %v1802_v6 }
 0x11e   :  { %1420 = vmatmul.mubr.msk.f32.gmra.mrb[22].mxu1 %vm480_vm2, %v375_v14 }
 0x11f   :  { %641 = vmatprep.mubr.f32.mxu1 %v1802_v6 }
 0x122   :  { %1421 = vmatmul.mubr.msk.f32.gmra.mrb[24].mxu1 %vm480_vm2, %v376_v17 }
 0x123   :  { %647 = vmatprep.mubr.f32.mxu1 %v1802_v6 }
 0x126   :  { %1422 = vmatmul.mubr.msk.f32.gmra.mrb[26].mxu1 %vm480_vm2, %v377_v18  ;;  %v2175_v18 = vpop.permute.xlu0 %462 }
 0x127   :  { %653 = vmatprep.mubr.f32.mxu1 %v1802_v6 }
 0x12a   :  { %1423 = vmatmul.mubr.msk.f32.gmra.mrb[28].mxu1 %vm480_vm2, %v378_v23 }
 0x12b   :  { %659 = vmatprep.mubr.f32.mxu1 %v1802_v6 }
 0x12e   :  { %1424 = vmatmul.mubr.msk.f32.gmra.mrb[30].mxu1 %vm480_vm2, %v379_v24 }
 0x12f   :  { %665 = vmatprep.mubr.f32.mxu1 %v1802_v6 }
 0x132   :  { %1425 = vmatmul.mubr.msk.f32.gmra.mrb[32].mxu1 %vm480_vm2, %v380_v25 }
 0x133   :  { %671 = vmatprep.mubr.f32.mxu1 %v1802_v6 }
 0x136   :  { %1426 = vmatmul.mubr.msk.f32.gmra.mrb[34].mxu1 %vm480_vm2, %v381_v26 }
 0x137   :  { %677 = vmatprep.mubr.f32.mxu1 %v1802_v6 }
 0x13a   :  { %1427 = vmatmul.mubr.msk.f32.gmra.mrb[36].mxu1 %vm480_vm2, %v382_v27 }
 0x13b   :  { %683 = vmatprep.mubr.f32.mxu1 %v1802_v6 }
 0x13e   :  { %1428 = vmatmul.mubr.msk.f32.gmra.mrb[38].mxu1 %vm480_vm2, %v383_v46 }
 0x13f   :  { %1602 = vmatprep.mubr.f32.mxu1 %v2133_v28 }
 0x1c2   :  { %v1548_v35 = vpop.f32.mrb[16].mxu0 }
 0x1c3   :  { %v762_v36 = vadd.f32 %v1548_v35, %v2136_v29  ;;  %v756_v37 = vpop.f32.mrb[17].mxu0 }
 0x1c4   :  { %v757_v38 = vadd.f32 %v756_v37, %v2138_v30 }
 0x1c5   :  { %v840_v40 = vmax.f32 %v762_v36, 0.0 }
 0x1c6   :  { %v837_v41 = vmax.f32 %v757_v38, 0.0  ;;  %v1551_v42 = vpop.f32.mrb[18].mxu0 }
 0x1c7   :  { %v772_v44 = vadd.f32 %v1551_v42, %v2140_v31  ;;  %v766_v45 = vpop.f32.mrb[19].mxu0 }
 0x1c8   :  { %v1697_v48 = vpack.c.bf16 %v840_v40, %v837_v41  ;;  %v767_v50 = vadd.f32 %v766_v45, %v2142_v32 }
 0x1c9   :  { %v846_v51 = vmax.f32 %v772_v44, 0.0 }
 0x1ca   :  { %v843_v47 = vmax.f32 %v767_v50, 0.0  ;;  %v1554_v52 = vpop.f32.mrb[20].mxu0  ;;  %1698 = vmatprep.subr.bf16.mxu1 %v1697_v48 }
 0x1cb   :  { %v782_v49 = vadd.f32 %v1554_v52, %v2144_v33  ;;  %v776_v54 = vpop.f32.mrb[21].mxu0  ;;  %1700 = vmatpush3.bf16.msra.mxu1 %v1697_v48 }
 0x1cc   :  { %v1701_v55 = vpack.c.bf16 %v846_v51, %v843_v47  ;;  %v777_v56 = vadd.f32 %v776_v54, %v2146_v34 }
 0x1cd   :  { %v852_v58 = vmax.f32 %v782_v49, 0.0 }
 0x1ce   :  { %v849_v59 = vmax.f32 %v777_v56, 0.0  ;;  %v1557_v61 = vpop.f32.mrb[22].mxu0  ;;  %1702 = vmatprep.subr.bf16.mxu1 %v1701_v55 }
 0x1cf   :  { %v792_v62 = vadd.f32 %v1557_v61, %v2150_v39  ;;  %v786_v63 = vpop.f32.mrb[23].mxu0  ;;  %1704 = vmatpush3.bf16.msra.mxu1 %v1701_v55 }
 0x1d0   :  { %v1705_v0 = vpack.c.bf16 %v852_v58, %v849_v59  ;;  %v787_v1 = vadd.f32 %v786_v63, %v2152_v43 }
 0x1d1   :  { %v858_v3 = vmax.f32 %v792_v62, 0.0 }
 0x1d2   :  { %v855_v4 = vmax.f32 %v787_v1, 0.0  ;;  %v1560_v60 = vpop.f32.mrb[24].mxu0  ;;  %1706 = vmatprep.subr.bf16.mxu1 %v1705_v0 }
 0x1d3   :  { %v802_v7 = vadd.f32 %v1560_v60, %v2156_v53  ;;  %v796_v8 = vpop.f32.mrb[25].mxu0  ;;  %1708 = vmatpush3.bf16.msra.mxu1 %v1705_v0 }
 0x1d4   :  { %v1709_v9 = vpack.c.bf16 %v858_v3, %v855_v4  ;;  %v797_v10 = vadd.f32 %v796_v8, %v2160_v57 }
 0x1d5   :  { %v864_v11 = vmax.f32 %v802_v7, 0.0  ;;  %v595_v12 = vpop.f32.mrb[8].mxu1 }
 0x1d6   :  { %v861_v13 = vmax.f32 %v797_v10, 0.0  ;;  %v597_v14 = vpop.f32.mrb[9].mxu1  ;;  %v1563_v15 = vpop.f32.mrb[26].mxu0  ;;  %1710 = vmatprep.subr.bf16.mxu1 %v1709_v9  ;;  %v596_v21 = vadd.f32 %v595_v12, %v2138_v30 }
 0x1d7   :  { %v812_v17 = vadd.f32 %v1563_v15, %v2164_v2  ;;  %v806_v19 = vpop.f32.mrb[27].mxu0  ;;  %1712 = vmatpush3.bf16.msra.mxu1 %v1709_v9  ;;  %v598_v23 = vadd.f32 %v597_v14, %v2138_v30  ;;  %v2182_v30 = vpop.permute.xlu1 %477 }
 0x1d8   :  { %v1713_v20 = vpack.c.bf16 %v864_v11, %v861_v13  ;;  %v807_v22 = vadd.f32 %v806_v19, %v2166_v5  ;;  %v835_v40 = vmax.f32 %v596_v21, 0.0 }
 0x1d9   :  { %v870_v24 = vmax.f32 %v812_v17, 0.0  ;;  %v601_v25 = vpop.f32.mrb[10].mxu1  ;;  %v836_v45 = vmax.f32 %v598_v23, 0.0  ;;  %v2195_v17 = vld [vmem:[%s2321_s5 + $0x8] sm:$0xff] }
 0x1da   :  { %v867_v26 = vmax.f32 %v807_v22, 0.0  ;;  %v602_v27 = vadd.f32 %v601_v25, %v2136_v29  ;;  %v603_v46 = vpop.f32.mrb[11].mxu1  ;;  %v1566_v35 = vpop.f32.mrb[28].mxu0  ;;  %1714 = vmatprep.subr.bf16.mxu1 %v1713_v20  ;;  %v2211_v25 = vld [vmem:[%s2321_s5 + $0x18] sm:$0xff] }
 0x1db   :  { %v604_v36 = vadd.f32 %v603_v46, %v2136_v29  ;;  %v822_v37 = vadd.f32 %v1566_v35, %v2170_v16  ;;  %v816_v38 = vpop.f32.mrb[29].mxu0  ;;  %1716 = vmatpush3.bf16.msra.mxu1 %v1713_v20  ;;  %v2184_v29 = vpop.permute.xlu0 %472 }
 0x1dc   :  { %v1717_v41 = vpack.c.bf16 %v870_v24, %v867_v26  ;;  %v838_v42 = vmax.f32 %v602_v27, 0.0  ;;  %v817_v44 = vadd.f32 %v816_v38, %v2175_v18 }
 0x1dd   :  { %v839_v48 = vmax.f32 %v604_v36, 0.0  ;;  %v876_v50 = vmax.f32 %v822_v37, 0.0  ;;  %v607_v51 = vpop.f32.mrb[12].mxu1 }
 0x1de   :  { %v1667_v47 = vpack.c.bf16 %v838_v42, %v835_v40  ;;  %v873_v52 = vmax.f32 %v817_v44, 0.0  ;;  %v609_v49 = vpop.f32.mrb[13].mxu1  ;;  %v1569_v54 = vpop.f32.mrb[30].mxu0  ;;  %1718 = vmatprep.subr.bf16.mxu1 %v1717_v41  ;;  %v608_v61 = vadd.f32 %v607_v51, %v2142_v32  ;;  %v2223_v40 = vld [vmem:[%s2321_s5 + $0x28] sm:$0xff]  ;;  %v2229_v42 = vld [vmem:[%s2321_s5 + $0x30] sm:$0xff] }
 0x1df   :  { %v1665_v55 = vpack.c.bf16 %v839_v48, %v836_v45  ;;  %v832_v56 = vadd.f32 %v1569_v54, %v2182_v30  ;;  %v826_v58 = vpop.f32.mrb[31].mxu0  ;;  %1720 = vmatpush3.bf16.msra.mxu1 %v1717_v41  ;;  %v610_v63 = vadd.f32 %v609_v49, %v2142_v32 }
 0x1e0   :  { %v1721_v59 = vpack.c.bf16 %v876_v50, %v873_v52  ;;  %v827_v62 = vadd.f32 %v826_v58, %v2184_v29  ;;  %v841_v8 = vmax.f32 %v608_v61, 0.0 }
 0x1e1   :  { %v882_v0 = vmax.f32 %v832_v56, 0.0  ;;  %v613_v1 = vpop.f32.mrb[14].mxu1  ;;  %1666 = vmatprep.subr.bf16.mxu0 %v1665_v55  ;;  %v842_v11 = vmax.f32 %v610_v63, 0.0 }
 0x1e2   :  { %v879_v3 = vmax.f32 %v827_v62, 0.0  ;;  %v614_v4 = vadd.f32 %v613_v1, %v2140_v31  ;;  %v615_v60 = vpop.f32.mrb[15].mxu1  ;;  %1668 = vmatpush1.bf16.msra.mxu0 %v1667_v47  ;;  %1722 = vmatprep.subr.bf16.mxu1 %v1721_v59  ;;  %v2239_v47 = vld [vmem:[%s2321_s5 + $0x38] sm:$0xff] }
 0x1e3   :  { %v616_v7 = vadd.f32 %v615_v60, %v2140_v31  ;;  %1724 = vmatpush3.bf16.msra.mxu1 %v1721_v59  ;;  %v2201_v31 = vld [vmem:[%s2321_s5 + $0x10] sm:$0xff] }
 0x1e4   :  { %v1725_v9 = vpack.c.bf16 %v882_v0, %v879_v3  ;;  %v844_v10 = vmax.f32 %v614_v4, 0.0 }
 0x1e5   :  { %v845_v12 = vmax.f32 %v616_v7, 0.0  ;;  %v619_v13 = vpop.f32.mrb[16].mxu1 }
 0x1e6   :  { %v1671_v14 = vpack.c.bf16 %v844_v10, %v841_v8  ;;  %v621_v32 = vpop.f32.mrb[17].mxu1  ;;  %1726 = vmatprep.subr.bf16.mxu1 %v1725_v9  ;;  %v620_v19 = vadd.f32 %v619_v13, %v2146_v34 }
 0x1e7   :  { %v1669_v15 = vpack.c.bf16 %v845_v12, %v842_v11  ;;  %1728 = vmatpush3.bf16.msra.mxu1 %v1725_v9  ;;  %v622_v20 = vadd.f32 %v621_v32, %v2146_v34  ;;  %v2216_v34 = vld [vmem:[%s2321_s5 + $0x20] sm:$0xff] }
 0x1e8   :  { %v847_v26 = vmax.f32 %v620_v19, 0.0 }
 0x1e9   :  { %v625_v21 = vpop.f32.mrb[18].mxu1  ;;  %1670 = vmatprep.subr.bf16.mxu0 %v1669_v15  ;;  %v848_v46 = vmax.f32 %v622_v20, 0.0 }
 0x1ea   :  { %v626_v22 = vadd.f32 %v625_v21, %v2144_v33  ;;  %v627_v23 = vpop.f32.mrb[19].mxu1  ;;  %1672 = vmatpush1.bf16.msra.mxu0 %v1671_v14  ;;  %1603 = vmatmul.mubr.f32.vlgmr.msra.gmra.mrb[40].mxu1 %v2195_v17 }
 0x1eb   :  { %v628_v24 = vadd.f32 %v627_v23, %v2144_v33  ;;  %1605 = vmatprep.mubr.f32.mxu1 %v2201_v31 }
 0x1ec   :  { %v850_v27 = vmax.f32 %v626_v22, 0.0 }
 0x1ed   :  { %v851_v35 = vmax.f32 %v628_v24, 0.0  ;;  %v631_v36 = vpop.f32.mrb[20].mxu1 }
 0x1ee   :  { %v1675_v37 = vpack.c.bf16 %v850_v27, %v847_v26  ;;  %v633_v38 = vpop.f32.mrb[21].mxu1  ;;  %1606 = vmatmul.mubr.f32.gmra.mrb[42].mxu1 %v2211_v25  ;;  %v632_v41 = vadd.f32 %v631_v36, %v2152_v43 }
 0x1ef   :  { %v1673_v33 = vpack.c.bf16 %v851_v35, %v848_v46  ;;  %1608 = vmatprep.mubr.f32.mxu1 %v2216_v34  ;;  %v634_v44 = vadd.f32 %v633_v38, %v2152_v43 }
 0x1f0   :  { %v853_v52 = vmax.f32 %v632_v41, 0.0 }
 0x1f1   :  { %v637_v45 = vpop.f32.mrb[22].mxu1  ;;  %1674 = vmatprep.subr.bf16.mxu0 %v1673_v33  ;;  %v854_v43 = vmax.f32 %v634_v44, 0.0 }
 0x1f2   :  { %v638_v48 = vadd.f32 %v637_v45, %v2150_v39  ;;  %v639_v50 = vpop.f32.mrb[23].mxu1  ;;  %1676 = vmatpush1.bf16.msra.mxu0 %v1675_v37  ;;  %1609 = vmatmul.mubr.f32.gmra.mrb[44].mxu1 %v2223_v40 }
 0x1f3   :  { %v640_v51 = vadd.f32 %v639_v50, %v2150_v39  ;;  %1611 = vmatprep.mubr.f32.mxu1 %v2229_v42 }
 0x1f4   :  { %v856_v49 = vmax.f32 %v638_v48, 0.0 }
 0x1f5   :  { %v857_v54 = vmax.f32 %v640_v51, 0.0  ;;  %v643_v55 = vpop.f32.mrb[24].mxu1 }
 0x1f6   :  { %v1679_v56 = vpack.c.bf16 %v856_v49, %v853_v52  ;;  %v645_v58 = vpop.f32.mrb[25].mxu1  ;;  %1612 = vmatmul.mubr.f32.gmra.mrb[46].mxu1 %v2239_v47  ;;  %v644_v61 = vadd.f32 %v643_v55, %v2160_v57 }
 0x1f7   :  { %v1677_v59 = vpack.c.bf16 %v857_v54, %v854_v43  ;;  %v646_v39 = vadd.f32 %v645_v58, %v2160_v57  ;;  %1630 = vmatprep.mubr.msk.f32.mxu1 %vm1805_vm3, %v1802_v6 }
 0x1f8   :  { %v859_v3 = vmax.f32 %v644_v61, 0.0 }
 0x1f9   :  { %v649_v62 = vpop.f32.mrb[26].mxu1  ;;  %1678 = vmatprep.subr.bf16.mxu0 %v1677_v59  ;;  %v860_v60 = vmax.f32 %v646_v39, 0.0 }
 0x1fa   :  { %v650_v63 = vadd.f32 %v649_v62, %v2156_v53  ;;  %v651_v0 = vpop.f32.mrb[27].mxu1  ;;  %1680 = vmatpush1.bf16.msra.mxu0 %v1679_v56 }
 0x1fb   :  { %v652_v1 = vadd.f32 %v651_v0, %v2156_v53 }
 0x1fc   :  { %v862_v4 = vmax.f32 %v650_v63, 0.0 }
 0x1fd   :  { %v863_v7 = vmax.f32 %v652_v1, 0.0  ;;  %v655_v8 = vpop.f32.mrb[28].mxu1 }
 0x1fe   :  { %v1683_v9 = vpack.c.bf16 %v862_v4, %v859_v3  ;;  %v657_v10 = vpop.f32.mrb[29].mxu1  ;;  %v656_v12 = vadd.f32 %v655_v8, %v2166_v5 }
 0x1ff   :  { %v1681_v11 = vpack.c.bf16 %v863_v7, %v860_v60  ;;  %v658_v57 = vadd.f32 %v657_v10, %v2166_v5 }
 0x200   :  { %v865_v15 = vmax.f32 %v656_v12, 0.0 }
 0x201   :  { %v661_v13 = vpop.f32.mrb[30].mxu1  ;;  %1682 = vmatprep.subr.bf16.mxu0 %v1681_v11  ;;  %v866_v20 = vmax.f32 %v658_v57, 0.0 }
 0x202   :  { %v662_v14 = vadd.f32 %v661_v13, %v2164_v2  ;;  %v663_v32 = vpop.f32.mrb[31].mxu1  ;;  %1684 = vmatpush1.bf16.msra.mxu0 %v1683_v9 }
 0x203   :  { %v664_v53 = vadd.f32 %v663_v32, %v2164_v2 }
 0x204   :  { %v868_v19 = vmax.f32 %v662_v14, 0.0 }
 0x205   :  { %v869_v21 = vmax.f32 %v664_v53, 0.0  ;;  %v667_v22 = vpop.f32.mrb[32].mxu1 }
 0x206   :  { %v1687_v23 = vpack.c.bf16 %v868_v19, %v865_v15  ;;  %v669_v24 = vpop.f32.mrb[33].mxu1  ;;  %v668_v27 = vadd.f32 %v667_v22, %v2175_v18 }
 0x207   :  { %v1685_v26 = vpack.c.bf16 %v869_v21, %v866_v20  ;;  %v670_v5 = vadd.f32 %v669_v24, %v2175_v18 }
 0x208   :  { %v871_v37 = vmax.f32 %v668_v27, 0.0 }
 0x209   :  { %v673_v46 = vpop.f32.mrb[34].mxu1  ;;  %1686 = vmatprep.subr.bf16.mxu0 %v1685_v26  ;;  %v872_v33 = vmax.f32 %v670_v5, 0.0  ;;  %v2290_v26 = vld [vmem:[%s2323_s7] sm:$0x3]  ;;  %s1807_s7 = smov [#allocation2]  }
 0x20a   :  { %v674_v35 = vadd.f32 %v673_v46, %v2170_v16  ;;  %v675_v36 = vpop.f32.mrb[35].mxu1  ;;  %1688 = vmatpush1.bf16.msra.mxu0 %v1687_v23  ;;  %s1386_s18 = sshll.u32 %s1807_s7, 4  ;;  %s1387_s18 = int_to_ptr.vmem [resolvable:$true] %s1386_s18 }
 0x20b   :  { %v676_v2 = vadd.f32 %v675_v36, %v2170_v16  ;;  %s1778_s19 = scalar_lea.vmem %s1387_s18, 96  ;;  %p1783_p1 = scmp.lt.s32.totalorder %s1387_s18, %s1387_s18 }
 0x20c   :  { %v874_v38 = vmax.f32 %v674_v35, 0.0  ;;  %p1779_p0 = scmp.ne.s32.totalorder %s1387_s18, %s1778_s19  ;;  %p1784_p2 = scmp.lt.s32.totalorder %s1778_s19, %s1778_s19 }
 0x20d   :  { %v875_v41 = vmax.f32 %v676_v2, 0.0  ;;  %v679_v44 = vpop.f32.mrb[36].mxu1 }
 0x20e   :  { %v1691_v45 = vpack.c.bf16 %v874_v38, %v871_v37  ;;  %v681_v48 = vpop.f32.mrb[37].mxu1  ;;  %v680_v51 = vadd.f32 %v679_v44, %v2184_v29  ;;  %p1785_p3 = por %p1784_p2, %p1783_p1 }
 0x20f   :  { %v1689_v50 = vpack.c.bf16 %v875_v41, %v872_v33  ;;  %v682_v18 = vadd.f32 %v681_v48, %v2184_v29  ;;  %v902_v29 = vpop.permute.xlu0 %901 }
 0x210   :  { %v877_v54 = vmax.f32 %v680_v51, 0.0  ;;  %p1786_p4 = pnand %p1785_p3, %p1779_p0 }
 0x211   :  { %v685_v52 = vpop.f32.mrb[38].mxu1  ;;  %1690 = vmatprep.subr.bf16.mxu0 %v1689_v50  ;;  %v878_v56 = vmax.f32 %v682_v18, 0.0 }
 0x212   :  { %v686_v49 = vadd.f32 %v685_v52, %v2182_v30  ;;  %v687_v43 = vpop.f32.mrb[39].mxu1  ;;  %1692 = vmatpush1.bf16.msra.mxu0 %v1691_v45 }
 0x213   :  { %v688_v16 = vadd.f32 %v687_v43, %v2182_v30  ;;  %v907_v30 = vpop.permute.xlu1 %906 }
 0x214   :  { %v880_v55 = vmax.f32 %v686_v49, 0.0 }
 0x215   :  { %v881_v58 = vmax.f32 %v688_v16, 0.0 }
 0x216   :  { %v1695_v59 = vpack.c.bf16 %v880_v55, %v877_v54 }
 0x217   :  { %v1693_v61 = vpack.c.bf16 %v881_v58, %v878_v56 }
 0x219   :  { %1694 = vmatprep.subr.bf16.mxu0 %v1693_v61 }
 0x21a   :  { %1696 = vmatpush1.bf16.msra.mxu0 %v1695_v59 }
 0x21d   :  { %1004 = vmatmul.mubr.f32.vlgmr.msra.gmra.mrb[32].mxu0 %v2133_v28  ;;  %v1804_v28 = vmov 0.0|0.0  }
 0x21e   :  { %1009 = vmatprep.mubr.f32.mxu0 %v1802_v6  ;;  %1745 = vmatprep.subr.bf16.mxu1 %v1804_v28 }
 0x221   :  { %1010 = vmatmul.mubr.f32.gmra.mrb[34].mxu0 %v2195_v17  ;;  %v2275_v17 = vpop.permute.xlu1 %916 }
 0x222   :  { %1015 = vmatprep.mubr.f32.mxu0 %v1802_v6 }
 0x225   :  { %1016 = vmatmul.mubr.f32.gmra.mrb[36].mxu0 %v2201_v31  ;;  %v2278_v1 = vpop.permute.xlu1 %926 }
 0x226   :  { %1021 = vmatprep.mubr.f32.mxu0 %v1802_v6 }
 0x229   :  { %1022 = vmatmul.mubr.f32.gmra.mrb[38].mxu0 %v2211_v25  ;;  %v912_v25 = vpop.permute.xlu0 %911  ;;  %v2281_v13 = vpop.permute.xlu1 %936 }
 0x22a   :  { %1027 = vmatprep.mubr.f32.mxu0 %v1802_v6 }
 0x22d   :  { %1028 = vmatmul.mubr.f32.gmra.mrb[40].mxu0 %v2216_v34 }
 0x22e   :  { %1033 = vmatprep.mubr.f32.mxu0 %v1802_v6 }
 0x231   :  { %1034 = vmatmul.mubr.f32.gmra.mrb[42].mxu0 %v2223_v40 }
 0x232   :  { %1039 = vmatprep.mubr.f32.mxu0 %v1802_v6 }
 0x235   :  { %1040 = vmatmul.mubr.f32.gmra.mrb[44].mxu0 %v2229_v42 }
 0x236   :  { %1045 = vmatprep.mubr.f32.mxu0 %v1802_v6 }
 0x239   :  { %1046 = vmatmul.mubr.f32.gmra.mrb[46].mxu0 %v2239_v47 }
 0x23a   :  { %1255 = vmatprep.mubr.f32.mxu0 %v1802_v6  ;;  %v922_v6 = vpop.permute.xlu0 %921 }
 0x23e   :  { %v2283_v53 = vpop.permute.xlu0 %931 }
 0x2bd   :  { %v1604_v31 = vpop.f32.mrb[40].mxu1 }
 0x2be   :  { %v1124_v34 = vadd.f32 %v1604_v31, %v907_v30  ;;  %v1118_v40 = vpop.f32.mrb[41].mxu1 }
 0x2bf   :  { %v1119_v42 = vadd.f32 %v1118_v40, %v902_v29 }
 0x2c0   :  { %v1162_v39 = vmax.f32 %v1124_v34, 0.0 }
 0x2c1   :  { %v1159_v62 = vmax.f32 %v1119_v42, 0.0  ;;  %v1607_v63 = vpop.f32.mrb[42].mxu1 }
 0x2c2   :  { %v1134_v47 = vadd.f32 %v1607_v63, %v2275_v17  ;;  %v1128_v0 = vpop.f32.mrb[43].mxu1 }
 0x2c3   :  { %v1746_v3 = vpack.c.bf16 %v1162_v39, %v1159_v62  ;;  %v1129_v4 = vadd.f32 %v1128_v0, %v912_v25 }
 0x2c4   :  { %v1168_v60 = vmax.f32 %v1134_v47, 0.0 }
 0x2c5   :  { %v1165_v7 = vmax.f32 %v1129_v4, 0.0  ;;  %v1610_v8 = vpop.f32.mrb[44].mxu1  ;;  %1747 = vmatpush3.bf16.msra.mxu1 %v1746_v3 }
 0x2c6   :  { %v1144_v9 = vadd.f32 %v1610_v8, %v2278_v1  ;;  %v1138_v10 = vpop.f32.mrb[45].mxu1  ;;  %1748 = vmatprep.subr.bf16.mxu1 %v1804_v28 }
 0x2c7   :  { %v1749_v11 = vpack.c.bf16 %v1168_v60, %v1165_v7  ;;  %v1139_v12 = vadd.f32 %v1138_v10, %v922_v6 }
 0x2c8   :  { %v1174_v57 = vmax.f32 %v1144_v9, 0.0 }
 0x2c9   :  { %v1171_v14 = vmax.f32 %v1139_v12, 0.0  ;;  %v1613_v32 = vpop.f32.mrb[46].mxu1  ;;  %1750 = vmatpush3.bf16.msra.mxu1 %v1749_v11 }
 0x2ca   :  { %v1154_v15 = vadd.f32 %v1613_v32, %v2281_v13  ;;  %v1148_v19 = vpop.f32.mrb[47].mxu1  ;;  %1751 = vmatprep.subr.bf16.mxu1 %v1804_v28 }
 0x2cb   :  { %v1752_v20 = vpack.c.bf16 %v1174_v57, %v1171_v14  ;;  %v1149_v21 = vadd.f32 %v1148_v19, %v2283_v53 }
 0x2cc   :  { %v1180_v22 = vmax.f32 %v1154_v15, 0.0 }
 0x2cd   :  { %v1177_v23 = vmax.f32 %v1149_v21, 0.0  ;;  %1753 = vmatpush3.bf16.msra.mxu1 %v1752_v20  ;;  %v1186_v21 = vpop.permute.xlu0 %1185 }
 0x2ce   :  { %1754 = vmatprep.subr.bf16.mxu1 %v1804_v28 }
 0x2cf   :  { %v1755_v24 = vpack.c.bf16 %v1180_v22, %v1177_v23 }
 0x2d1   :  { %1756 = vmatpush3.bf16.msra.mxu1 %v1755_v24 }
 0x2d4   :  { %1631 = vmatmul.mubr.msk.f32.vlgmr.msra.gmra.mrb[48].mxu1 %vm480_vm2, %v2290_v26 }
 0x2f0   :  { %v1005_v27 = vpop.f32.mrb[32].mxu0 }
 0x2f1   :  { %v1007_v5 = vpop.f32.mrb[33].mxu0  ;;  %v1006_v46 = vadd.f32 %v1005_v27, %v902_v29 }
 0x2f2   :  { %v1008_v35 = vadd.f32 %v1007_v5, %v902_v29 }
 0x2f3   :  { %v1157_v33 = vmax.f32 %v1006_v46, 0.0 }
 0x2f4   :  { %v1011_v36 = vpop.f32.mrb[34].mxu0  ;;  %v1158_v44 = vmax.f32 %v1008_v35, 0.0 }
 0x2f5   :  { %v1012_v2 = vadd.f32 %v1011_v36, %v907_v30  ;;  %v1013_v37 = vpop.f32.mrb[35].mxu0 }
 0x2f6   :  { %v1014_v38 = vadd.f32 %v1013_v37, %v907_v30 }
 0x2f7   :  { %v1160_v41 = vmax.f32 %v1012_v2, 0.0 }
 0x2f8   :  { %v1161_v45 = vmax.f32 %v1014_v38, 0.0  ;;  %v1017_v48 = vpop.f32.mrb[36].mxu0 }
 0x2f9   :  { %v1731_v50 = vpack.c.bf16 %v1160_v41, %v1157_v33  ;;  %v1019_v51 = vpop.f32.mrb[37].mxu0  ;;  %v1018_v52 = vadd.f32 %v1017_v48, %v912_v25  ;;  %v1332_v41 = vlaneseq }
 0x2fa   :  { %v1729_v18 = vpack.c.bf16 %v1161_v45, %v1158_v44  ;;  %v1020_v49 = vadd.f32 %v1019_v51, %v912_v25  ;;  %v1806_v44 = vmov 1983009808  }
 0x2fb   :  { %v1163_v56 = vmax.f32 %v1018_v52, 0.0  ;;  %v1364_v45 = vunpack.c.l.s4 %v1806_v44  ;;  %v1333_v48 = vshrl.u32 %v1332_v41, 7 }
 0x2fc   :  { %v1023_v43 = vpop.f32.mrb[38].mxu0  ;;  %1730 = vmatprep.subr.bf16.mxu0 %v1729_v18  ;;  %v1164_v59 = vmax.f32 %v1020_v49, 0.0 }
 0x2fd   :  { %v1024_v16 = vadd.f32 %v1023_v43, %v2275_v17  ;;  %v1025_v54 = vpop.f32.mrb[39].mxu0  ;;  %1732 = vmatpush1.bf16.msra.mxu0 %v1731_v50  ;;  %v1365_v50 = vunpack.c.0.s8 %v1364_v45  ;;  %vm1334_vm4 = vcmp.eq.s32.totalorder %v1333_v48, 0 }
 0x2fe   :  { %v1026_v55 = vadd.f32 %v1025_v54, %v2275_v17 }
 0x2ff   :  { %v1166_v58 = vmax.f32 %v1024_v16, 0.0 }
 0x300   :  { %v1167_v61 = vmax.f32 %v1026_v55, 0.0  ;;  %v1029_v28 = vpop.f32.mrb[40].mxu0  ;;  %v1368_v55 = vsub.s32 %v1365_v50, %v1333_v48 }
 0x301   :  { %v1735_v30 = vpack.c.bf16 %v1166_v58, %v1163_v56  ;;  %v1030_v29 = vadd.f32 %v1029_v28, %v922_v6  ;;  %v1031_v31 = vpop.f32.mrb[41].mxu0 }
 0x302   :  { %v1733_v34 = vpack.c.bf16 %v1167_v61, %v1164_v59  ;;  %v1032_v40 = vadd.f32 %v1031_v31, %v922_v6 }
 0x303   :  { %v1169_v63 = vmax.f32 %v1030_v29, 0.0 }
 0x304   :  { %v1035_v42 = vpop.f32.mrb[42].mxu0  ;;  %1734 = vmatprep.subr.bf16.mxu0 %v1733_v34  ;;  %v1170_v47 = vmax.f32 %v1032_v40, 0.0 }
 0x305   :  { %v1036_v25 = vadd.f32 %v1035_v42, %v2278_v1  ;;  %v1037_v39 = vpop.f32.mrb[43].mxu0  ;;  %1736 = vmatpush1.bf16.msra.mxu0 %v1735_v30 }
 0x306   :  { %v1038_v62 = vadd.f32 %v1037_v39, %v2278_v1 }
 0x307   :  { %v1172_v17 = vmax.f32 %v1036_v25, 0.0 }
 0x308   :  { %v1173_v0 = vmax.f32 %v1038_v62, 0.0  ;;  %v1041_v3 = vpop.f32.mrb[44].mxu0 }
 0x309   :  { %v1739_v4 = vpack.c.bf16 %v1172_v17, %v1169_v63  ;;  %v1043_v60 = vpop.f32.mrb[45].mxu0  ;;  %v1042_v8 = vadd.f32 %v1041_v3, %v2283_v53 }
 0x30a   :  { %v1737_v7 = vpack.c.bf16 %v1173_v0, %v1170_v47  ;;  %v1044_v6 = vadd.f32 %v1043_v60, %v2283_v53 }
 0x30b   :  { %v1175_v12 = vmax.f32 %v1042_v8, 0.0 }
 0x30c   :  { %v1047_v9 = vpop.f32.mrb[46].mxu0  ;;  %1738 = vmatprep.subr.bf16.mxu0 %v1737_v7  ;;  %v1176_v14 = vmax.f32 %v1044_v6, 0.0 }
 0x30d   :  { %v1048_v10 = vadd.f32 %v1047_v9, %v2281_v13  ;;  %v1049_v11 = vpop.f32.mrb[47].mxu0  ;;  %1740 = vmatpush1.bf16.msra.mxu0 %v1739_v4 }
 0x30e   :  { %v1050_v1 = vadd.f32 %v1049_v11, %v2281_v13 }
 0x30f   :  { %v1178_v57 = vmax.f32 %v1048_v10, 0.0 }
 0x310   :  { %v1179_v32 = vmax.f32 %v1050_v1, 0.0 }
 0x311   :  { %v1743_v15 = vpack.c.bf16 %v1178_v57, %v1175_v12 }
 0x312   :  { %v1741_v19 = vpack.c.bf16 %v1179_v32, %v1176_v14 }
 0x314   :  { %1742 = vmatprep.subr.bf16.mxu0 %v1741_v19 }
 0x315   :  { %1744 = vmatpush1.bf16.msra.mxu0 %v1743_v15 }
 0x318   :  { %1445 = vmatmul.mubr.msk.f32.vlgmr.msra.gmra.mrb[48].mxu0 %vm480_vm2, %v2290_v26 }
 0x3a7   :  { %v1328_v53 = vpop.f32.mrb[48].mxu1 }
 0x3a8   :  { %v1632_v20 = vpop.f32.mrb[49].mxu1  ;;  %v1329_v22 = vadd.f32 %v1328_v53, %v1186_v21 }
 0x3aa   :  { %v1449_v23 = vmul.f32 -1.442695, %v1329_v22  ;;  %v1355_v49 = vmax.f32 %v1329_v22, 0.0 }
 0x3ac   :  { %1766 = vpow2.f32 %v1449_v23 }
 0x3b6   :  { %v1767_v36 = vpop.eup %1766 }
 0x3b7   :  { %v1346_v2 = vadd.f32 1.0, %v1767_v36 }
 0x3eb   :  { %v1257_v24 = vpop.f32.mrb[48].mxu0 }
 0x3ec   :  { %v1258_v27 = vadd.f32 %v1257_v24, %v1186_v21  ;;  %v1259_v13 = vpop.f32.mrb[49].mxu0 }
 0x3ed   :  { %v1260_v5 = vadd.f32 %v1259_v13, %v1186_v21 }
 0x3ee   :  { %v1447_v46 = vmul.f32 -1.442695, %v1258_v27  ;;  %v1353_v18 = vmax.f32 %v1258_v27, 0.0 }
 0x3ef   :  { %v1448_v35 = vmul.f32 -1.442695, %v1260_v5  ;;  %v1354_v43 = vmax.f32 %v1260_v5, 0.0 }
 0x3f0   :  { %1768 = vpow2.f32 %v1447_v46 }
 0x3f1   :  { %1770 = vpow2.f32 %v1448_v35 }
 0x3f2   :  { %1772 = vrcp.f32 %v1346_v2 }
 0x3fa   :  { %v1769_v37 = vpop.eup %1768 }
 0x3fb   :  { %v1771_v38 = vpop.eup %1770  ;;  %v1344_v33 = vadd.f32 1.0, %v1769_v37 }
 0x3fc   :  { %v1345_v26 = vadd.f32 1.0, %v1771_v38  ;;  %v1773_v51 = vpop.eup %1772 }
 0x3fd   :  { %1774 = vrcp.f32 %v1344_v33  ;;  %v1358_v58 = vsel %vm1334_vm4, %v1773_v51, %v1355_v49 }
 0x3fe   :  { %1776 = vrcp.f32 %v1345_v26  ;;  %v1376_v28 = vrot.slane %v1358_v58, %v1368_v55 }
 0x407   :  { %v1775_v52 = vpop.eup %1774 }
 0x408   :  { %v1777_v16 = vpop.eup %1776  ;;  %v1356_v54 = vsel %vm1334_vm4, %v1775_v52, %v1353_v18 }
 0x409   :  { %v1357_v56 = vsel %vm1334_vm4, %v1777_v16, %v1354_v43 }
 0x40a   :  { %v1362_v59 = vcombine.low %v1356_v54, %v1357_v56 }
 0x40c   :  { %v1369_v61 = vrot.slane %v1362_v59, %v1368_v55 }
 0x40e   :  { %v1377_v30 = vcombine.low %v1369_v61, %v1376_v28 }
 0x410   :  { %1379 = vst [vmem:[#allocation2] sm:$0x3f] %v1377_v30 }
 0x411   :  { %1789 = shalt.err (!%p1786_p4)
}
 0x412   :  { %s1790_s0 = scalar_lea.hbm %s2325_s9, 96 }
 0x413   :  { %p1791_p5 = scmp.ne.s32.totalorder %s2325_s9, %s1790_s0  ;;  %p1794_p6 = scmp.lt.u32.totalorder %s1790_s0, %s2325_s9 }
 0x415   :  { %p1796_p7 = pnand %p1794_p6, %p1791_p5 }
 0x417   :  { %1799 = shalt.err (!%p1796_p7)
}
 0x418   :  { %1389 = dma.vmem_to_hbm [thread:$0]  %s1387_s18, 96, %s2325_s9, [#allocation3]  }
 0x419   :  { %1800 = dma.done.wait [#allocation3], 96  }
 0x41a   :  { %1801 = vsyncadd [#allocation3], 4294967200 }
 0x41b   :  { %1393 = vsyncpa [#allocation3], 1 }

</bundles_post_ra>
